<compile_context>
chip_gen: v7x
topology: tpu7x:2x2x1
jax: 0.10.0
libtpu: 0.0.40
codegen_flags: <defaults>
</compile_context>

<pallas_src>
import math

import jax
import jax.numpy as jnp
from jax.experimental import pallas as pl
from jax.experimental.pallas import tpu as pltpu


def _pointwise_conv_kernel(x_ref, w_ref, b_ref, o_ref):
    """out = W @ x + b for one lane-dense tile.

    x_ref: (C_in, T), w_ref: (C_out, C_in), b_ref: (C_out, 1), o_ref: (C_out, T).
    """
    y = jnp.dot(w_ref[...], x_ref[...], preferred_element_type=jnp.float32)
    y = y + b_ref[...].astype(jnp.float32)
    o_ref[...] = y.astype(o_ref.dtype)


def _round_up(x, m):
    return ((x + m - 1) // m) * m


def _choose_tile(c_in, c_out, length, itemsize, vmem_budget_bytes):
    """Pick the lane-tile size from a VMEM budget.

    Budget covers the double-buffered input and output blocks
    (2 * (C_in + C_out) * T * itemsize bytes), staying well inside v5e's 16 MiB
    scoped-VMEM default and v7x's 64 MiB physical VMEM (so no vmem_limit bump
    is needed on any generation).
    """
    per_lane = 2 * (c_in + c_out) * max(itemsize, 1)
    t = vmem_budget_bytes // max(per_lane, 1)
    # Multiple of 256 (clean MXU cadence on v6e/v7x, unmasked lane-dense vst),
    # clamped to the measured 256..2048 DMA sweet spot.
    t = max(256, min(2048, (t // 256) * 256))
    if length <= t:
        # Single block covering the full axis: always satisfies the
        # (8,128)-or-full-dim layout rule, even for tiny L.
        return length
    return t


def _outconv1d_tiled_l(x, weight, bias2d, tile_l, vmem_budget_bytes, cost):
    """Long-L regime: grid (N, L // TL), weight/bias stay resident."""
    N, C_in, L = x.shape
    C_out = weight.shape[0]
    if tile_l is None:
        tile_l = _choose_tile(C_in, C_out, L, x.dtype.itemsize, vmem_budget_bytes)
    grid = (N, pl.cdiv(L, tile_l))
    return pl.pallas_call(
        _pointwise_conv_kernel,
        out_shape=jax.ShapeDtypeStruct((N, C_out, L), x.dtype),
        grid=grid,
        in_specs=[
            pl.BlockSpec((pl.Squeezed(), C_in, tile_l), lambda n, t: (n, 0, t)),
            pl.BlockSpec((C_out, C_in), lambda n, t: (0, 0)),
            pl.BlockSpec((C_out, 1), lambda n, t: (0, 0)),
        ],
        out_specs=pl.BlockSpec((pl.Squeezed(), C_out, tile_l),
                               lambda n, t: (n, 0, t)),
        compiler_params=pltpu.CompilerParams(
            # Both axes independent; lets v7x's 2 TensorCores split the L tiles
            # even when N == 1. Harmless on v5e/v6e (single TC).
            dimension_semantics=("parallel", "parallel"),
        ),
        cost_estimate=cost,
    )(x, weight, bias2d)


def _outconv1d_folded(x, weight, bias2d, tile_l, vmem_budget_bytes, cost):
    """Small-L / large-N regime: fold batch into the lane axis."""
    N, C_in, L = x.shape
    C_out = weight.shape[0]
    M = N * L
    # One-time relayout so grid steps are big and stores are lane-dense.
    x2 = jnp.transpose(x, (1, 0, 2)).reshape(C_in, M)
    if tile_l is None:
        tile_l = _choose_tile(C_in, C_out, M, x.dtype.itemsize, vmem_budget_bytes)
    grid = (pl.cdiv(M, tile_l),)
    y2 = pl.pallas_call(
        _pointwise_conv_kernel,
        out_shape=jax.ShapeDtypeStruct((C_out, M), x.dtype),
        grid=grid,
        in_specs=[
            pl.BlockSpec((C_in, tile_l), lambda t: (0, t)),
            pl.BlockSpec((C_out, C_in), lambda t: (0, 0)),
            pl.BlockSpec((C_out, 1), lambda t: (0, 0)),
        ],
        out_specs=pl.BlockSpec((C_out, tile_l), lambda t: (0, t)),
        compiler_params=pltpu.CompilerParams(
            dimension_semantics=("parallel",),
        ),
        cost_estimate=cost,
    )(x2, weight, bias2d)
    return jnp.transpose(y2.reshape(C_out, N, L), (1, 0, 2))


def outconv1d(x, weight, bias, *, tile_l=None, fold_threshold=512,
              vmem_budget_bytes=8 * 1024 * 1024):
    """Pointwise Conv1d (kernel_size=1) == UNet1d's OutConv1d forward.

    x:      (N, C_in, L)
    weight: (C_out, C_in) or PyTorch layout (C_out, C_in, 1)
    bias:   (C_out,)
    returns (N, C_out, L) in x.dtype
    """
    N, C_in, L = x.shape
    if weight.ndim == 3:           # PyTorch Conv1d weight (C_out, C_in, 1)
        weight = weight[:, :, 0]
    C_out = weight.shape[0]
    weight = weight.astype(x.dtype)      # feed the MXU in the activation dtype
    bias2d = bias.reshape(C_out, 1)      # upcast to f32 inside the kernel

    itemsize = x.dtype.itemsize
    cost = pl.CostEstimate(
        flops=2 * N * C_out * C_in * L,
        transcendentals=0,
        bytes_accessed=((N * C_in * L + N * C_out * L) * itemsize
                        + weight.size * weight.dtype.itemsize
                        + bias2d.size * bias2d.dtype.itemsize),
    )

    if L < fold_threshold:
        return _outconv1d_folded(x, weight, bias2d, tile_l, vmem_budget_bytes, cost)
    return _outconv1d_tiled_l(x, weight, bias2d, tile_l, vmem_budget_bytes, cost)


def init_outconv1d_params(key, in_channels, out_channels, kernel_size=1,
                          dtype=jnp.float32):
    """Deterministic init mimicking PyTorch Conv1d default (U(+/- 1/sqrt(fan_in)))."""
    k_w, k_b = jax.random.split(key)
    bound = 1.0 / math.sqrt(in_channels * kernel_size)
    weight = jax.random.uniform(
        k_w, (out_channels, in_channels), dtype=dtype, minval=-bound, maxval=bound)
    bias = jax.random.uniform(
        k_b, (out_channels,), dtype=dtype, minval=-bound, maxval=bound)
    return weight, bias


if __name__ == "__main__":
    key = jax.random.PRNGKey(0)
    k_x1, k_x2, k_x3, k_p = jax.random.split(key, 4)

    # UNet1d's OutConv sees (N, sizes[0]=16, L) and maps to n_out_channels.
    C_in, C_out = 16, 2
    weight, bias = init_outconv1d_params(k_p, C_in, C_out, kernel_size=1)

    def reference(x, w, b):
        return (jnp.einsum("oc,ncl->nol",
                           w.astype(jnp.float32), x.astype(jnp.float32))
                + b.astype(jnp.float32)[None, :, None])

    ok = True

    # 1) Small-L / batched regime -> folded (C_in, N*L) path.
    x1 = jax.random.normal(k_x1, (4, C_in, 16), dtype=jnp.float32)
    out1 = jax.block_until_ready(outconv1d(x1, weight, bias))
    ok &= out1.shape == (4, C_out, 16)
    ok &= bool(jnp.allclose(out1.astype(jnp.float32), reference(x1, weight, bias),
                            atol=1e-5, rtol=1e-5))

    # 2) Long-L regime -> per-batch L-tiled path (force a small tile so the
    #    grid really has several lane tiles: grid = (2, 3)).
    x2 = jax.random.normal(k_x2, (2, C_in, 1536), dtype=jnp.float32)
    out2 = jax.block_until_ready(outconv1d(x2, weight, bias, tile_l=512))
    ok &= out2.shape == (2, C_out, 1536)
    ok &= bool(jnp.allclose(out2.astype(jnp.float32), reference(x2, weight, bias),
                            atol=1e-5, rtol=1e-5))

    # 3) bf16 activations/weights (MXU takes bf16, f32 accumulation + bias add).
    xb = jax.random.normal(k_x3, (2, C_in, 512), dtype=jnp.float32).astype(jnp.bfloat16)
    wb, bb = weight.astype(jnp.bfloat16), bias.astype(jnp.bfloat16)
    out3 = jax.block_until_ready(outconv1d(xb, wb, bb))
    ok &= out3.dtype == jnp.bfloat16
    ok &= bool(jnp.allclose(out3.astype(jnp.float32), reference(xb, wb, bb),
                            atol=5e-2, rtol=5e-2))

    if ok:
        print("KERNEL_OK")
    else:
        raise SystemExit("outconv1d mismatch vs reference")
</pallas_src>

<mosaic_0001>
module attributes {stable_mosaic.version = 11 : i64} {
  func.func @_pointwise_conv_kernel(%arg0: i32, %arg1: memref<16x64xf32, #tpu.memory_space<vmem>>, %arg2: memref<2x16xf32, #tpu.memory_space<vmem>>, %arg3: memref<2x1xf32, #tpu.memory_space<vmem>>, %arg4: memref<2x64xf32, #tpu.memory_space<vmem>>) attributes {dimension_semantics = [#tpu.dimension_semantics<parallel>], iteration_bounds = array<i64: 1>, scalar_prefetch = 0 : i64, scratch_operands = 0 : i64, tpu.core_type = #tpu.core_type<tc>, window_params = [{transform_indices = @transform_0, window_bounds = array<i64: 16, 64>}, {pipeline_mode = #tpu.pipeline_mode<synchronous>, transform_indices = @transform_1, window_bounds = array<i64: 2, 16>}, {pipeline_mode = #tpu.pipeline_mode<synchronous>, transform_indices = @transform_2, window_bounds = array<i64: 2, 1>}, {transform_indices = @transform_3, window_bounds = array<i64: 2, 64>}]} {
    %c0 = arith.constant 0 : index
    %c0_0 = arith.constant 0 : index
    %0 = vector.load %arg2[%c0, %c0_0] : memref<2x16xf32, #tpu.memory_space<vmem>>, vector<2x16xf32>
    %c0_1 = arith.constant 0 : index
    %c0_2 = arith.constant 0 : index
    %1 = vector.load %arg1[%c0_1, %c0_2] : memref<16x64xf32, #tpu.memory_space<vmem>>, vector<16x64xf32>
    %cst = arith.constant dense<0.000000e+00> : vector<2x64xf32>
    %2 = tpu.matmul %0, %1, %cst {dimension_numbers = #tpu.dot_dimension_numbers<[1], [0], [0], [1], [0, 0, 1, 1], [], []>} : vector<2x16xf32>, vector<16x64xf32>, vector<2x64xf32> -> vector<2x64xf32>
    %c0_3 = arith.constant 0 : index
    %c0_4 = arith.constant 0 : index
    %3 = vector.load %arg3[%c0_3, %c0_4] : memref<2x1xf32, #tpu.memory_space<vmem>>, vector<2x1xf32>
    %4 = vector.broadcast %3 : vector<2x1xf32> to vector<2x64xf32>
    %5 = arith.addf %2, %4 : vector<2x64xf32>
    %c0_5 = arith.constant 0 : index
    %c0_6 = arith.constant 0 : index
    %6 = vector.load %arg4[%c0_5, %c0_6] : memref<2x64xf32, #tpu.memory_space<vmem>>, vector<2x64xf32>
    tpu.vector_store %arg4[%c0_5, %c0_6], %5 {strides = array<i32>} : memref<2x64xf32, #tpu.memory_space<vmem>>, vector<2x64xf32>,
    return
  }
  func.func @transform_0(%arg0: i32) -> (i32, i32) {
    %c0_i32 = arith.constant 0 : i32
    %c0_i32_0 = arith.constant 0 : i32
    return %c0_i32, %arg0 : i32, i32
  }
  func.func @transform_1(%arg0: i32) -> (i32, i32) {
    %c0_i32 = arith.constant 0 : i32
    %c0_i32_0 = arith.constant 0 : i32
    %c0_i32_1 = arith.constant 0 : i32
    return %c0_i32, %c0_i32_0 : i32, i32
  }
  func.func @transform_2(%arg0: i32) -> (i32, i32) {
    %c0_i32 = arith.constant 0 : i32
    %c0_i32_0 = arith.constant 0 : i32
    %c0_i32_1 = arith.constant 0 : i32
    return %c0_i32, %c0_i32_0 : i32, i32
  }
  func.func @transform_3(%arg0: i32) -> (i32, i32) {
    %c0_i32 = arith.constant 0 : i32
    %c0_i32_0 = arith.constant 0 : i32
    return %c0_i32, %arg0 : i32, i32
  }
}

</mosaic_0001>

<bundles_post_ra>
// kernel: tpu_custom_call.1
= control target key start
LH: loop header
LB: loop body
LE: loop exit
PB: predicated region body
PF: predicated region fallthrough
CT: control target
= control target key end

     0   :  { %8 = vsyncpa [#allocation3], 0  ;;  %s258_s0 = inlined_call_operand.hbm [shape: f32[16,64], index: 0, kind: input, shape index: {}]   ;;  %s259_s1 = inlined_call_operand.vmem [shape: f32[2,16], index: 1, kind: input, shape index: {}]   ;;  %s260_s2 = inlined_call_operand.vmem [shape: f32[2,1], index: 2, kind: input, shape index: {}]   ;;  %s261_s3 = inlined_call_operand.hbm [shape: f32[2,64], index: 3, kind: output, shape index: {}]  }
   0x1   :  { %9 = vsyncpa [#allocation4], 0  ;;  %s200_s12 = smov [#allocation2]   ;;  %s152_s16 = scalar_lea.hbm %s258_s0, 256 }
   0x2   :  { %s15_s13 = sshll.u32 %s200_s12, 4  ;;  %p153_p0 = scmp.ne.s32.totalorder %s258_s0, %s152_s16  ;;  %s16_s13 = int_to_ptr.vmem [resolvable:$true] %s15_s13 }
   0x3   :  { %p156_p1 = scmp.lt.u32.totalorder %s152_s16, %s258_s0 }
   0x5   :  { %p158_p2 = pnand %p156_p1, %p153_p0 }
   0x7   :  { %161 = shalt.err (!%p158_p2)
}
   0x8   :  { %s162_s21 = scalar_lea.vmem %s16_s13, 256  ;;  %p167_p4 = scmp.lt.s32.totalorder %s16_s13, %s16_s13 }
   0x9   :  { %p163_p3 = scmp.ne.s32.totalorder %s16_s13, %s162_s21  ;;  %p168_p5 = scmp.lt.s32.totalorder %s162_s21, %s162_s21 }
   0xb   :  { %p169_p6 = por %p168_p5, %p167_p4 }
   0xd   :  { %p170_p7 = pnand %p169_p6, %p163_p3 }
   0xf   :  { %173 = shalt.err (!%p170_p7)
}
  0x10   :  { %s201_s22 = smov 128   ;;  %s202_s23 = smov 8  }
  0x11   :  { %21 = dma.hbm_to_vmem [thread:$0]  %s258_s0, 256, %s16_s13, [#allocation3], %s201_s22, %s201_s22, %s202_s23  }
  0x12   :  { %196 = dma.done.wait [#allocation3], 256  }
  0x13   :  { %197 = vsyncadd [#allocation3], 4294967040  ;;  %v203_v0 = vmov 0.0|0.0   ;;  %vm204_vm0 = vmmov 0   ;;  %v205_v1 = vmov 0.0   ;;  %v206_v2 = vmov 0  }
  0x14   :  { %140 = vmatprep.subr.bf16.mxu0 %v203_v0  ;;  %137 = vmatprep.mubr.msk.f32.mxu0 %vm204_vm0, %v205_v1  ;;  %v30_v3 = vld [vmem:[#allocation2] sm:$0xff]  ;;  %v31_v4 = vld [vmem:[#allocation2 + $0x8] sm:$0xff]  ;;  %vm38_vm1 = vcmask 130048   ;;  %s207_s29 = smov [#allocation5]   ;;  %vm112_vm2 = vcmask 517120  }
  0x15   :  { %151 = vset.pattern.permute.xlu0 %v206_v2  ;;  %v141_v5 = vpack.c.bf16 %v31_v4, %v30_v3  ;;  %v32_v6 = vld [vmem:[%s260_s2] sm:$0x3]  ;;  %s120_s30 = sshll.u32 %s207_s29, 4  ;;  %s121_s30 = int_to_ptr.vmem [resolvable:$true] %s120_s30 }
  0x16   :  { %35 = vperm.xlu0 %151, %v32_v6   ;;  %v29_v7 = vld [vmem:[%s259_s1] sm:$0x3]  ;;  %s174_s4 = scalar_lea.vmem %s121_s30, 32  ;;  %p179_p9 = scmp.lt.s32.totalorder %s121_s30, %s121_s30 }
  0x17   :  { %142 = vmatpush3.bf16.msra.mxu0 %v141_v5  ;;  %p175_p8 = scmp.ne.s32.totalorder %s121_s30, %s174_s4  ;;  %p180_p10 = scmp.lt.s32.totalorder %s174_s4, %s174_s4 }
  0x19   :  { %p181_p11 = por %p180_p10, %p179_p9 }
  0x1a   :  { %138 = vmatmul.mubr.msk.f32.vlgmr.msra.gmra.mrb[0].mxu0 %vm38_vm1, %v29_v7 }
  0x1b   :  { %p182_p12 = pnand %p181_p11, %p175_p8 }
  0x95   :  { %v36_v8 = vpop.permute.xlu0 %35 }
  0xed   :  { %v108_v9 = vpop.f32.mrb[0].mxu0 }
  0xee   :  { %v109_v10 = vadd.f32 %v108_v9, %v36_v8  ;;  %v139_v11 = vpop.f32.mrb[1].mxu0 }
  0xf0   :  { %113 = vst.msk [vmem:[#allocation5] sm:$0x3] %vm112_vm2, %v109_v10 }
  0xf1   :  { %185 = shalt.err (!%p182_p12)
}
  0xf2   :  { %s186_s5 = scalar_lea.hbm %s261_s3, 32 }
  0xf3   :  { %p187_p13 = scmp.ne.s32.totalorder %s261_s3, %s186_s5  ;;  %p190_p0 = scmp.lt.u32.totalorder %s186_s5, %s261_s3 }
  0xf5   :  { %p192_p1 = pnand %p190_p0, %p187_p13 }
  0xf7   :  { %195 = shalt.err (!%p192_p1)
}
  0xf8   :  { %123 = dma.vmem_to_hbm [thread:$0]  %s121_s30, 32, %s261_s3, [#allocation4]  }
  0xf9   :  { %198 = dma.done.wait [#allocation4], 32  }
  0xfa   :  { %199 = vsyncadd [#allocation4], 4294967264 }
  0xfb   :  { %127 = vsyncpa [#allocation3], 1 }
  0xfc   :  { %128 = vsyncpa [#allocation4], 1 }

</bundles_post_ra>
